<compile_context>
chip_gen: v6e
topology: v6e:2x2x1
jax: 0.10.0
libtpu: 0.0.40
codegen_flags: <defaults>
</compile_context>

<pallas_src>
import jax
import jax.numpy as jnp
from jax.experimental import pallas as pl
from jax.experimental.pallas import tpu as pltpu

EMBED_SIZE = 256
FPN_CHANNELS = 256
FPN_STRIDES = (4, 8, 16, 32, 64)          # levels '0','1','2','3','pool'
NUM_LEVELS = len(FPN_STRIDES)
IN_FEATURES = FPN_CHANNELS * NUM_LEVELS   # 1280

_SLAB = 256                               # sub-slab rows for the in-kernel streamed reduction
# VMEM budget for one double-buffered bf16 input block (+ f32 reduction temps).  Kept well
# under every generation's scoped default; vmem_limit_bytes below is the explicit cap.
_VMEM_BLOCK_BUDGET = 24 * 1024 * 1024
# Safe on all generations: v5e/v6e have 128 MiB physical (raise to 64-96 MiB if sweeping
# bigger b_tile x hw_tile); keep <= ~48 MiB on v7x (64 MiB physical, leave headroom).
_VMEM_LIMIT_BYTES = 48 * 1024 * 1024


def _cdiv(a, b):
    return (a + b - 1) // b


def _pick_b_tile(batch, hw_blk, ch):
    """Largest batch tile (divisor of batch, preferring the whole batch) under the VMEM budget."""
    # Worst case per batch row: double-buffered bf16 block + a full f32 reduction temp.
    per_row = hw_blk * ch * (2 * 2 + 4)
    max_bt = max(1, _VMEM_BLOCK_BUDGET // per_row)
    if batch <= max_bt:
        return batch                       # no batch padding, single batch tile for small B
    bt = int(max_bt)
    while batch % bt:
        bt -= 1
    return bt


def _pool_sum_kernel(x_ref, out_ref):
    """Accumulate the HW-sum of one feature-level chunk.

    x_ref   : (b_tile, hw_blk, 256) bf16
    out_ref : (b_tile, 1, 256) f32 -- resident across the HW-chunk (reduction) axis.
    """
    c = pl.program_id(1)

    @pl.when(c == 0)
    def _init():
        out_ref[...] = jnp.zeros_like(out_ref)

    hw_blk = x_ref.shape[1]
    if hw_blk > _SLAB and hw_blk % _SLAB == 0:
        # Streamed sub-slab reduction: never materializes a full-block f32 temp in VMEM,
        # so hw_tile can grow to 1024-2048 without blowing the scoped limit.
        def body(s, acc):
            start = pl.multiple_of(s * _SLAB, _SLAB)
            xs = x_ref[:, pl.ds(start, _SLAB), :].astype(jnp.float32)
            return acc + jnp.sum(xs, axis=1, keepdims=True)

        partial = jax.lax.fori_loop(0, hw_blk // _SLAB, body,
                                    jnp.zeros(out_ref.shape, jnp.float32),
                                    unroll=True)
    else:
        # Small block (tiny level or small chunk): the f32 temp is bounded and cheap.
        partial = jnp.sum(x_ref[...].astype(jnp.float32), axis=1, keepdims=True)

    out_ref[...] += partial


def _pool_level_sum(x, *, hw_tile):
    """x: (B, HW, 256) bf16 -> (B, 256) f32 sum over HW (mean divisor folded into fc weight)."""
    B, HW, C = x.shape
    if HW <= hw_tile:
        # Whole level in one block: no padding at all (block == full array along HW).
        hw_blk, n_chunks, x_in = HW, 1, x
    else:
        hw_blk = hw_tile
        n_chunks = _cdiv(HW, hw_tile)
        pad = n_chunks * hw_tile - HW
        # Zero padding is benign for the sum; only the (rare) tail chunk is padded.
        x_in = jnp.pad(x, ((0, 0), (0, pad), (0, 0))) if pad else x

    b_tile = _pick_b_tile(B, hw_blk, C)

    out = pl.pallas_call(
        _pool_sum_kernel,
        out_shape=jax.ShapeDtypeStruct((B, 1, C), jnp.float32),
        grid=(B // b_tile, n_chunks),
        in_specs=[pl.BlockSpec((b_tile, hw_blk, C), lambda b, c: (b, c, 0))],
        out_specs=pl.BlockSpec((b_tile, 1, C), lambda b, c: (b, 0, 0)),
        compiler_params=pltpu.CompilerParams(
            # Batch-tile axis parallel (v7x megacore); HW reduction axis last, arbitrary.
            # TODO(synk): with a single batch tile on v7x, a leading parallel split of the
            # chunk range (per-core partial sums + tiny epilogue) would keep the 2nd TC busy.
            dimension_semantics=("parallel", "arbitrary"),
            vmem_limit_bytes=_VMEM_LIMIT_BYTES,
        ),
    )(x_in)
    return out[:, 0, :]


def _fc_kernel(p0_ref, p1_ref, p2_ref, p3_ref, p4_ref, w_ref, b_ref, out_ref):
    """Deferred fc: one pass over the five pooled level sums with the pre-scaled weight.

    p*_ref : (B, 256) f32 per-level HW sums
    w_ref  : (1280, 256) f32, rows pre-scaled by 1/HW_level
    b_ref  : (1, 256) f32
    out_ref: (B, 256) f32
    """
    acc = jnp.zeros(out_ref.shape, jnp.float32)
    for l, p_ref in enumerate((p0_ref, p1_ref, p2_ref, p3_ref, p4_ref)):
        w_l = w_ref[l * FPN_CHANNELS:(l + 1) * FPN_CHANNELS, :]
        acc = acc + jnp.dot(p_ref[...], w_l, preferred_element_type=jnp.float32)
    out_ref[...] = acc + b_ref[...]


def encoder_forward(fpn_features, fc_w, fc_b, *, hw_tile=1024):
    """fpn_features: list of 5 (B, HW_l, 256) bf16 channel-last levels; fc_w: (1280, E); fc_b: (E,).

    Returns (B, embed_size) float32 embeddings.
    hw_tile: chunk size for levels larger than one block.  Sweep 512/1024 on v5e/v6e and
    1024-2048 on v7x (small blocks there are per-step-overhead dominated; even 2048-row
    blocks stay far below its 64 MiB VMEM).
    """
    assert len(fpn_features) == NUM_LEVELS
    B = fpn_features[0].shape[0]

    # Per-level HW-sum pooling: bandwidth-bound Pallas streaming, no concat / no batch pad.
    pooled_sums = [_pool_level_sum(f, hw_tile=hw_tile) for f in fpn_features]

    # Fold the per-level 1/HW mean divisor into the fc weight rows.  Level-major row order
    # matches torch's concat over sorted(features.keys()) == '0','1','2','3','pool'.
    hw_sizes = jnp.array([f.shape[1] for f in fpn_features], dtype=jnp.float32)
    inv_hw = jnp.repeat(1.0 / hw_sizes, FPN_CHANNELS)           # (1280,)
    w_scaled = (fc_w * inv_hw[:, None]).astype(jnp.float32)     # (1280, E)

    # Single deferred matmul over the five pooled sums (weight ~1.25 MiB, fully resident).
    out = pl.pallas_call(
        _fc_kernel,
        out_shape=jax.ShapeDtypeStruct((B, EMBED_SIZE), jnp.float32),
    )(*pooled_sums, w_scaled, fc_b.reshape(1, EMBED_SIZE).astype(jnp.float32))
    return out


def synthetic_fpn_backbone(images, key):
    """Deterministic stand-in for the maskrcnn_resnet50_fpn backbone (plain JAX glue).

    images: (B, 3, H, W) NCHW.  Level l: (B, (H/s_l)*(W/s_l), 256) bf16, channel-last —
    emitted directly in the dtype/layout the Pallas kernels consume (no wrapper re-cast copy).
    """
    B, C, H, W = images.shape
    feats = []
    for i, s in enumerate(FPN_STRIDES):
        h, w = H // s, W // s
        x = images.reshape(B, C, h, s, w, s).mean(axis=(3, 5))    # stride-s avg pool
        wproj = jax.random.normal(jax.random.fold_in(key, i), (C, FPN_CHANNELS),
                                  dtype=jnp.float32)
        f = jnp.einsum("bchw,cd->bhwd", x, wproj)                 # (B, h, w, 256)
        feats.append(f.reshape(B, h * w, FPN_CHANNELS).astype(jnp.bfloat16))
    return feats


def init_fc_params(key):
    # nn.init.xavier_uniform_ on fc.weight (embed_size, in_features); bias zeros.
    bound = (6.0 / (IN_FEATURES + EMBED_SIZE)) ** 0.5
    w_torch = jax.random.uniform(key, (EMBED_SIZE, IN_FEATURES),
                                 minval=-bound, maxval=bound, dtype=jnp.float32)
    fc_w = w_torch.T                                  # kernel uses (in, out) layout
    fc_b = jnp.zeros((EMBED_SIZE,), dtype=jnp.float32)
    return fc_w, fc_b


if __name__ == "__main__":
    key = jax.random.PRNGKey(0)
    k_img, k_backbone, k_fc = jax.random.split(key, 3)

    B, C, H, W = 2, 3, 64, 64
    images = jax.random.normal(k_img, (B, C, H, W), dtype=jnp.float32)

    fpn_features = synthetic_fpn_backbone(images, k_backbone)     # 5 x (B, HW_l, 256) bf16
    fc_w, fc_b = init_fc_params(k_fc)

    embeddings = encoder_forward(fpn_features, fc_w, fc_b, hw_tile=1024)
    embeddings = jax.block_until_ready(embeddings)

    # Plain-JAX reference using the same bf16 features the kernels consume.
    feats_f32 = [f.astype(jnp.float32) for f in fpn_features]
    pooled_ref = jnp.concatenate([f.mean(axis=1) for f in feats_f32], axis=-1)   # (B, 1280)
    ref = jnp.dot(pooled_ref, fc_w, precision=jax.lax.Precision.HIGHEST) + fc_b

    assert embeddings.shape == (B, EMBED_SIZE), embeddings.shape
    max_err = float(jnp.max(jnp.abs(embeddings - ref)))
    assert jnp.allclose(embeddings, ref, atol=1e-3, rtol=1e-2), max_err

    print("KERNEL_OK")
</pallas_src>

<mosaic_0001>
module attributes {stable_mosaic.version = 11 : i64} {
  func.func @_pool_sum_kernel(%arg0: i32, %arg1: i32, %arg2: memref<2x256x256xbf16, #tpu.memory_space<vmem>>, %arg3: memref<2x1x256xf32, #tpu.memory_space<vmem>>) attributes {dimension_semantics = [#tpu.dimension_semantics<parallel>, #tpu.dimension_semantics<arbitrary>], iteration_bounds = array<i64: 1, 1>, scalar_prefetch = 0 : i64, scratch_operands = 0 : i64, tpu.core_type = #tpu.core_type<tc>, window_params = [{transform_indices = @transform_0, window_bounds = array<i64: 2, 256, 256>}, {transform_indices = @transform_1, window_bounds = array<i64: 2, 1, 256>}]} {
    %c0_i32 = arith.constant 0 : i32
    %0 = arith.cmpi eq, %arg1, %c0_i32 : i32
    %1 = arith.extui %0 : i1 to i32
    %c0_i32_0 = arith.constant 0 : i32
    %2 = arith.cmpi ne, %1, %c0_i32_0 : i32
    scf.if %2 {
      %cst_9 = arith.constant 0.000000e+00 : f32
      %10 = vector.broadcast %cst_9 : f32 to vector<2x1x256xf32>
      %c0_10 = arith.constant 0 : index
      %c0_11 = arith.constant 0 : index
      %c0_12 = arith.constant 0 : index
      %11 = vector.load %arg3[%c0_10, %c0_11, %c0_12] : memref<2x1x256xf32, #tpu.memory_space<vmem>>, vector<2x1x256xf32>
      tpu.vector_store %arg3[%c0_10, %c0_11, %c0_12], %10 {strides = array<i32>} : memref<2x1x256xf32, #tpu.memory_space<vmem>>, vector<2x1x256xf32>,
    } else {
    }
    %c0 = arith.constant 0 : index
    %c0_1 = arith.constant 0 : index
    %c0_2 = arith.constant 0 : index
    %3 = vector.load %arg2[%c0, %c0_1, %c0_2] : memref<2x256x256xbf16, #tpu.memory_space<vmem>>, vector<2x256x256xbf16>
    %4 = arith.extf %3 : vector<2x256x256xbf16> to vector<2x256x256xf32>
    %cst = arith.constant dense<0.000000e+00> : vector<2x256xf32>
    %5 = vector.multi_reduction <add>, %4, %cst [1] : vector<2x256x256xf32> to vector<2x256xf32>
    %6 = vector.shape_cast %5 : vector<2x256xf32> to vector<2x1x256xf32>
    %c0_3 = arith.constant 0 : index
    %c0_4 = arith.constant 0 : index
    %c0_5 = arith.constant 0 : index
    %7 = vector.load %arg3[%c0_3, %c0_4, %c0_5] : memref<2x1x256xf32, #tpu.memory_space<vmem>>, vector<2x1x256xf32>
    %8 = arith.addf %7, %6 : vector<2x1x256xf32>
    %c0_6 = arith.constant 0 : index
    %c0_7 = arith.constant 0 : index
    %c0_8 = arith.constant 0 : index
    %9 = vector.load %arg3[%c0_6, %c0_7, %c0_8] : memref<2x1x256xf32, #tpu.memory_space<vmem>>, vector<2x1x256xf32>
    tpu.vector_store %arg3[%c0_6, %c0_7, %c0_8], %8 {strides = array<i32>} : memref<2x1x256xf32, #tpu.memory_space<vmem>>, vector<2x1x256xf32>,
    return
  }
  func.func @transform_0(%arg0: i32, %arg1: i32) -> (i32, i32, i32) {
    %c0_i32 = arith.constant 0 : i32
    %c0_i32_0 = arith.constant 0 : i32
    return %arg0, %arg1, %c0_i32 : i32, i32, i32
  }
  func.func @transform_1(%arg0: i32, %arg1: i32) -> (i32, i32, i32) {
    %c0_i32 = arith.constant 0 : i32
    %c0_i32_0 = arith.constant 0 : i32
    %c0_i32_1 = arith.constant 0 : i32
    return %arg0, %c0_i32, %c0_i32_0 : i32, i32, i32
  }
}

</mosaic_0001>

<bundles_post_ra>
// kernel: tpu_custom_call.1
= control target key start
LH: loop header
LB: loop body
LE: loop exit
PB: predicated region body
PF: predicated region fallthrough
CT: control target
= control target key end

     0   :  { %6 = vsyncpa [#allocation3], 0  ;;  %s526_s0 = inlined_call_operand.hbm [shape: bf16[2,256,256], index: 0, kind: input, shape index: {}]   ;;  %s527_s1 = inlined_call_operand.hbm [shape: f32[2,1,256], index: 1, kind: output, shape index: {}]  }
   0x1   :  { %7 = vsyncpa [#allocation4], 0  ;;  %s488_s6 = smov [#allocation2]  }
   0x2   :  { %s13_s7 = sshll.u32 %s488_s6, 4  ;;  %s14_s7 = int_to_ptr.vmem [resolvable:$true] %s13_s7 }
   0x3   :  { %s452_s8 = scalar_lea.vmem %s14_s7, 8192  ;;  %p457_p1 = scmp.lt.s32.totalorder %s14_s7, %s14_s7 }
   0x4   :  { %p453_p0 = scmp.ne.s32.totalorder %s14_s7, %s452_s8  ;;  %p458_p2 = scmp.lt.s32.totalorder %s452_s8, %s452_s8 }
   0x6   :  { %p459_p3 = por %p458_p2, %p457_p1 }
   0x8   :  { %p460_p4 = pnand %p459_p3, %p453_p0 }
   0xa   :  { %463 = shalt.err (!%p460_p4)
}
   0xb   :  { %s489_s9 = smov 128   ;;  %s490_s10 = smov 8  }
   0xc   :  { %19 = dma.hbm_to_vmem [thread:$0]  %s526_s0, 8192, %s14_s7, [#allocation3], %s489_s9, %s489_s9, %s490_s10  }
   0xd   :  { %484 = dma.done.wait [#allocation3], 8192  }
   0xe   :  { %485 = vsyncadd [#allocation3], 4294959104  ;;  %v27_v0 = vlaneseq  ;;  %v491_v2 = vmov 0.0   ;;  %v33_v3 = vld [vmem:[#allocation2] sm:$0xff]  ;;  %v34_v4 = vld [vmem:[#allocation2 + $0x8] sm:$0xff]  ;;  %s493_s0 = smov [#allocation5]  }
   0xf   :  { %v35_v5 = vld [vmem:[#allocation2 + $0x10] sm:$0xff]  ;;  %v97_v6 = vunpack.c.l.bf16 %v33_v3  ;;  %v98_v7 = vunpack.c.h.bf16 %v33_v3  ;;  %v99_v8 = vunpack.c.l.bf16 %v34_v4  ;;  %v100_v9 = vunpack.c.h.bf16 %v34_v4  ;;  %v36_v10 = vld [vmem:[#allocation2 + $0x18] sm:$0xff]  ;;  %v37_v13 = vld [vmem:[#allocation2 + $0x20] sm:$0xff]  ;;  %s424_s13 = sshll.u32 %s493_s0, 4  ;;  %s425_s13 = int_to_ptr.vmem [resolvable:$true] %s424_s13 }
  0x10   :  { %vm510_vm0 = vcmp.lt.s32.totalorder %v27_v0, 256  ;;  %v101_v11 = vunpack.c.l.bf16 %v35_v5  ;;  %v102_v12 = vunpack.c.h.bf16 %v35_v5  ;;  %v103_v14 = vunpack.c.l.bf16 %v36_v10  ;;  %v38_v18 = vld [vmem:[#allocation2 + $0x28] sm:$0xff]  ;;  %v39_v23 = vld [vmem:[#allocation2 + $0x30] sm:$0xff]  ;;  %v40_v28 = vld [vmem:[#allocation2 + $0x38] sm:$0xff]  ;;  %s464_s14 = scalar_lea.vmem %s425_s13, 64  ;;  %p469_p6 = scmp.lt.s32.totalorder %s425_s13, %s425_s13 }
  0x11   :  { %31 = vst.msk [vmem:[#allocation5] sm:$0x3] %vm510_vm0, %v491_v2  ;;  %32 = vst.msk [vmem:[#allocation5 + $0x2] sm:$0x3] %vm510_vm0, %v491_v2  ;;  %v104_v15 = vunpack.c.h.bf16 %v36_v10  ;;  %v225_v16 = vadd.f32 %v99_v8, %v97_v6  ;;  %v262_v17 = vadd.f32 %v100_v9, %v98_v7  ;;  %v105_v19 = vunpack.c.l.bf16 %v37_v13  ;;  %v41_v33 = vld [vmem:[#allocation2 + $0x40] sm:$0xff]  ;;  %v42_v38 = vld [vmem:[#allocation2 + $0x48] sm:$0xff]  ;;  %p465_p5 = scmp.ne.s32.totalorder %s425_s13, %s464_s14  ;;  %p470_p7 = scmp.lt.s32.totalorder %s464_s14, %s464_s14 }
  0x12   :  { %v106_v20 = vunpack.c.h.bf16 %v37_v13  ;;  %v107_v24 = vunpack.c.l.bf16 %v38_v18  ;;  %v108_v25 = vunpack.c.h.bf16 %v38_v18  ;;  %v109_v29 = vunpack.c.l.bf16 %v39_v23  ;;  %v43_v43 = vld [vmem:[#allocation2 + $0x50] sm:$0xff]  ;;  %v44_v48 = vld [vmem:[#allocation2 + $0x58] sm:$0xff]  ;;  %v65_v53 = vld [vmem:[#allocation2 + $0x100] sm:$0xff] }
  0x13   :  { %v226_v21 = vadd.f32 %v225_v16, %v101_v11  ;;  %v263_v22 = vadd.f32 %v262_v17, %v102_v12  ;;  %v110_v30 = vunpack.c.h.bf16 %v39_v23  ;;  %v111_v34 = vunpack.c.l.bf16 %v40_v28  ;;  %v66_v54 = vld [vmem:[#allocation2 + $0x108] sm:$0xff]  ;;  %v45_v55 = vld [vmem:[#allocation2 + $0x60] sm:$0xff]  ;;  %v67_v60 = vld [vmem:[#allocation2 + $0x110] sm:$0xff]  ;;  %p471_p8 = por %p470_p7, %p469_p6 }
  0x14   :  { %v112_v35 = vunpack.c.h.bf16 %v40_v28  ;;  %v113_v39 = vunpack.c.l.bf16 %v41_v33  ;;  %v114_v40 = vunpack.c.h.bf16 %v41_v33  ;;  %v115_v44 = vunpack.c.l.bf16 %v42_v38  ;;  %v46_v61 = vld [vmem:[#allocation2 + $0x68] sm:$0xff]  ;;  %v68_v8 = vld [vmem:[#allocation2 + $0x118] sm:$0xff]  ;;  %v47_v9 = vld [vmem:[#allocation2 + $0x70] sm:$0xff] }
  0x15   :  { %v227_v26 = vadd.f32 %v226_v21, %v103_v14  ;;  %v264_v27 = vadd.f32 %v263_v22, %v104_v15  ;;  %v116_v45 = vunpack.c.h.bf16 %v42_v38  ;;  %v117_v49 = vunpack.c.l.bf16 %v43_v43  ;;  %v69_v16 = vld [vmem:[#allocation2 + $0x120] sm:$0xff]  ;;  %v48_v17 = vld [vmem:[#allocation2 + $0x78] sm:$0xff]  ;;  %p472_p9 = pnand %p471_p8, %p465_p5 }
  0x16   :  { %v118_v50 = vunpack.c.h.bf16 %v43_v43  ;;  %v119_v56 = vunpack.c.l.bf16 %v44_v48  ;;  %v120_v57 = vunpack.c.h.bf16 %v44_v48  ;;  %v161_v62 = vunpack.c.l.bf16 %v65_v53 }
  0x17   :  { %v228_v31 = vadd.f32 %v227_v26, %v105_v19  ;;  %v265_v32 = vadd.f32 %v264_v27, %v106_v20  ;;  %v162_v63 = vunpack.c.h.bf16 %v65_v53  ;;  %v163_v2 = vunpack.c.l.bf16 %v66_v54  ;;  %v70_v26 = vld [vmem:[#allocation2 + $0x128] sm:$0xff]  ;;  %v49_v27 = vld [vmem:[#allocation2 + $0x80] sm:$0xff] }
  0x18   :  { %v164_v3 = vunpack.c.h.bf16 %v66_v54  ;;  %v121_v4 = vunpack.c.l.bf16 %v45_v55  ;;  %v122_v5 = vunpack.c.h.bf16 %v45_v55  ;;  %v165_v10 = vunpack.c.l.bf16 %v67_v60 }
  0x19   :  { %v229_v36 = vadd.f32 %v228_v31, %v107_v24  ;;  %v266_v37 = vadd.f32 %v265_v32, %v108_v25  ;;  %v166_v11 = vunpack.c.h.bf16 %v67_v60  ;;  %v123_v12 = vunpack.c.l.bf16 %v46_v61 }
  0x1a   :  { %v124_v13 = vunpack.c.h.bf16 %v46_v61  ;;  %v167_v18 = vunpack.c.l.bf16 %v68_v8  ;;  %v168_v19 = vunpack.c.h.bf16 %v68_v8  ;;  %v299_v20 = vadd.f32 %v163_v2, %v161_v62 }
  0x1b   :  { %v230_v41 = vadd.f32 %v229_v36, %v109_v29  ;;  %v267_v42 = vadd.f32 %v266_v37, %v110_v30  ;;  %v336_v21 = vadd.f32 %v164_v3, %v162_v63  ;;  %v125_v22 = vunpack.c.l.bf16 %v47_v9  ;;  %v71_v36 = vld [vmem:[#allocation2 + $0x130] sm:$0xff]  ;;  %v50_v37 = vld [vmem:[#allocation2 + $0x88] sm:$0xff] }
  0x1c   :  { %v126_v23 = vunpack.c.h.bf16 %v47_v9  ;;  %v169_v28 = vunpack.c.l.bf16 %v69_v16  ;;  %v170_v29 = vunpack.c.h.bf16 %v69_v16  ;;  %v300_v30 = vadd.f32 %v299_v20, %v165_v10 }
  0x1d   :  { %v231_v46 = vadd.f32 %v230_v41, %v111_v34  ;;  %v268_v47 = vadd.f32 %v267_v42, %v112_v35  ;;  %v337_v31 = vadd.f32 %v336_v21, %v166_v11  ;;  %v127_v32 = vunpack.c.l.bf16 %v48_v17 }
  0x1e   :  { %v128_v33 = vunpack.c.h.bf16 %v48_v17  ;;  %v171_v38 = vunpack.c.l.bf16 %v70_v26  ;;  %v129_v42 = vunpack.c.l.bf16 %v49_v27  ;;  %v130_v43 = vunpack.c.h.bf16 %v49_v27 }
  0x1f   :  { %v232_v51 = vadd.f32 %v231_v46, %v113_v39  ;;  %v269_v52 = vadd.f32 %v268_v47, %v114_v40  ;;  %v172_v39 = vunpack.c.h.bf16 %v70_v26  ;;  %v301_v40 = vadd.f32 %v300_v30, %v167_v18  ;;  %v72_v46 = vld [vmem:[#allocation2 + $0x138] sm:$0xff]  ;;  %v51_v47 = vld [vmem:[#allocation2 + $0x90] sm:$0xff] }
  0x20   :  { %v338_v41 = vadd.f32 %v337_v31, %v168_v19  ;;  %v173_v48 = vunpack.c.l.bf16 %v71_v36  ;;  %v132_v53 = vunpack.c.h.bf16 %v50_v37  ;;  %v133_v62 = vunpack.c.l.bf16 %v51_v47 }
  0x21   :  { %v233_v58 = vadd.f32 %v232_v51, %v115_v44  ;;  %v270_v59 = vadd.f32 %v269_v52, %v116_v45  ;;  %v131_v52 = vunpack.c.l.bf16 %v50_v37  ;;  %v134_v63 = vunpack.c.h.bf16 %v51_v47 }
  0x22   :  { %v339_v51 = vadd.f32 %v338_v41, %v170_v29 }
  0x23   :  { %v234_v6 = vadd.f32 %v233_v58, %v117_v49  ;;  %v271_v7 = vadd.f32 %v270_v59, %v118_v50  ;;  %v174_v49 = vunpack.c.h.bf16 %v71_v36  ;;  %v302_v50 = vadd.f32 %v301_v40, %v169_v28 }
  0x24   :  { %v175_v58 = vunpack.c.l.bf16 %v72_v46  ;;  %v176_v59 = vunpack.c.h.bf16 %v72_v46  ;;  %v340_v61 = vadd.f32 %v339_v51, %v172_v39 }
  0x25   :  { %v235_v14 = vadd.f32 %v234_v6, %v119_v56  ;;  %v272_v15 = vadd.f32 %v271_v7, %v120_v57  ;;  %v73_v56 = vld [vmem:[#allocation2 + $0x140] sm:$0xff]  ;;  %v52_v57 = vld [vmem:[#allocation2 + $0x98] sm:$0xff]  ;;  %v303_v60 = vadd.f32 %v302_v50, %v171_v38 }
  0x26   :  { %v177_v6 = vunpack.c.l.bf16 %v73_v56  ;;  %v178_v7 = vunpack.c.h.bf16 %v73_v56  ;;  %v341_v9 = vadd.f32 %v340_v61, %v174_v49  ;;  %v135_v10 = vunpack.c.l.bf16 %v52_v57 }
  0x27   :  { %v236_v24 = vadd.f32 %v235_v14, %v121_v4  ;;  %v273_v25 = vadd.f32 %v272_v15, %v122_v5  ;;  %v74_v4 = vld [vmem:[#allocation2 + $0x148] sm:$0xff]  ;;  %v53_v5 = vld [vmem:[#allocation2 + $0xa0] sm:$0xff]  ;;  %v304_v8 = vadd.f32 %v303_v60, %v173_v48  ;;  %v136_v11 = vunpack.c.h.bf16 %v52_v57  ;;  %v75_v14 = vld [vmem:[#allocation2 + $0x150] sm:$0xff] }
  0x28   :  { %v54_v15 = vld [vmem:[#allocation2 + $0xa8] sm:$0xff]  ;;  %v179_v16 = vunpack.c.l.bf16 %v74_v4  ;;  %v180_v17 = vunpack.c.h.bf16 %v74_v4  ;;  %v342_v19 = vadd.f32 %v341_v9, %v176_v59  ;;  %v137_v20 = vunpack.c.l.bf16 %v53_v5 }
  0x29   :  { %v237_v34 = vadd.f32 %v236_v24, %v123_v12  ;;  %v274_v35 = vadd.f32 %v273_v25, %v124_v13  ;;  %v305_v18 = vadd.f32 %v304_v8, %v175_v58  ;;  %v138_v21 = vunpack.c.h.bf16 %v53_v5  ;;  %v76_v24 = vld [vmem:[#allocation2 + $0x158] sm:$0xff]  ;;  %v55_v25 = vld [vmem:[#allocation2 + $0xb0] sm:$0xff] }
  0x2a   :  { %v181_v26 = vunpack.c.l.bf16 %v75_v14  ;;  %v182_v27 = vunpack.c.h.bf16 %v75_v14  ;;  %v343_v29 = vadd.f32 %v342_v19, %v178_v7  ;;  %v139_v30 = vunpack.c.l.bf16 %v54_v15 }
  0x2b   :  { %v238_v44 = vadd.f32 %v237_v34, %v125_v22  ;;  %v275_v45 = vadd.f32 %v274_v35, %v126_v23  ;;  %v306_v28 = vadd.f32 %v305_v18, %v177_v6  ;;  %v140_v31 = vunpack.c.h.bf16 %v54_v15  ;;  %v77_v34 = vld [vmem:[#allocation2 + $0x160] sm:$0xff]  ;;  %v56_v35 = vld [vmem:[#allocation2 + $0xb8] sm:$0xff] }
  0x2c   :  { %v183_v36 = vunpack.c.l.bf16 %v76_v24  ;;  %v184_v37 = vunpack.c.h.bf16 %v76_v24  ;;  %v344_v39 = vadd.f32 %v343_v29, %v180_v17  ;;  %v141_v40 = vunpack.c.l.bf16 %v55_v25 }
  0x2d   :  { %v239_v54 = vadd.f32 %v238_v44, %v127_v32  ;;  %v276_v55 = vadd.f32 %v275_v45, %v128_v33  ;;  %v307_v38 = vadd.f32 %v306_v28, %v179_v16  ;;  %v142_v41 = vunpack.c.h.bf16 %v55_v25  ;;  %v78_v44 = vld [vmem:[#allocation2 + $0x168] sm:$0xff]  ;;  %v57_v45 = vld [vmem:[#allocation2 + $0xc0] sm:$0xff] }
  0x2e   :  { %v185_v46 = vunpack.c.l.bf16 %v77_v34  ;;  %v186_v47 = vunpack.c.h.bf16 %v77_v34  ;;  %v345_v49 = vadd.f32 %v344_v39, %v182_v27  ;;  %v143_v50 = vunpack.c.l.bf16 %v56_v35 }
  0x2f   :  { %v240_v2 = vadd.f32 %v239_v54, %v129_v42  ;;  %v277_v3 = vadd.f32 %v276_v55, %v130_v43  ;;  %v308_v48 = vadd.f32 %v307_v38, %v181_v26  ;;  %v144_v51 = vunpack.c.h.bf16 %v56_v35  ;;  %v79_v54 = vld [vmem:[#allocation2 + $0x170] sm:$0xff]  ;;  %v58_v55 = vld [vmem:[#allocation2 + $0xc8] sm:$0xff] }
  0x30   :  { %v187_v56 = vunpack.c.l.bf16 %v78_v44  ;;  %v188_v57 = vunpack.c.h.bf16 %v78_v44  ;;  %v346_v59 = vadd.f32 %v345_v49, %v184_v37  ;;  %v145_v60 = vunpack.c.l.bf16 %v57_v45 }
  0x31   :  { %v241_v12 = vadd.f32 %v240_v2, %v131_v52  ;;  %v278_v13 = vadd.f32 %v277_v3, %v132_v53  ;;  %v309_v58 = vadd.f32 %v308_v48, %v183_v36  ;;  %v146_v61 = vunpack.c.h.bf16 %v57_v45  ;;  %v80_v2 = vld [vmem:[#allocation2 + $0x178] sm:$0xff]  ;;  %v59_v3 = vld [vmem:[#allocation2 + $0xd0] sm:$0xff] }
  0x32   :  { %v189_v4 = vunpack.c.l.bf16 %v79_v54  ;;  %v190_v5 = vunpack.c.h.bf16 %v79_v54  ;;  %v347_v7 = vadd.f32 %v346_v59, %v186_v47  ;;  %v147_v8 = vunpack.c.l.bf16 %v58_v55 }
  0x33   :  { %v242_v22 = vadd.f32 %v241_v12, %v133_v62  ;;  %v279_v23 = vadd.f32 %v278_v13, %v134_v63  ;;  %v310_v6 = vadd.f32 %v309_v58, %v185_v46  ;;  %v148_v9 = vunpack.c.h.bf16 %v58_v55  ;;  %v81_v12 = vld [vmem:[#allocation2 + $0x180] sm:$0xff]  ;;  %v60_v13 = vld [vmem:[#allocation2 + $0xd8] sm:$0xff] }
  0x34   :  { %v191_v14 = vunpack.c.l.bf16 %v80_v2  ;;  %v192_v15 = vunpack.c.h.bf16 %v80_v2  ;;  %v348_v17 = vadd.f32 %v347_v7, %v188_v57  ;;  %v149_v18 = vunpack.c.l.bf16 %v59_v3 }
  0x35   :  { %v243_v32 = vadd.f32 %v242_v22, %v135_v10  ;;  %v280_v33 = vadd.f32 %v279_v23, %v136_v11  ;;  %v311_v16 = vadd.f32 %v310_v6, %v187_v56  ;;  %v150_v19 = vunpack.c.h.bf16 %v59_v3  ;;  %v82_v22 = vld [vmem:[#allocation2 + $0x188] sm:$0xff]  ;;  %v61_v23 = vld [vmem:[#allocation2 + $0xe0] sm:$0xff] }
  0x36   :  { %v193_v24 = vunpack.c.l.bf16 %v81_v12  ;;  %v194_v25 = vunpack.c.h.bf16 %v81_v12  ;;  %v349_v27 = vadd.f32 %v348_v17, %v190_v5  ;;  %v151_v28 = vunpack.c.l.bf16 %v60_v13 }
  0x37   :  { %v244_v42 = vadd.f32 %v243_v32, %v137_v20  ;;  %v281_v43 = vadd.f32 %v280_v33, %v138_v21  ;;  %v312_v26 = vadd.f32 %v311_v16, %v189_v4  ;;  %v152_v29 = vunpack.c.h.bf16 %v60_v13  ;;  %v83_v32 = vld [vmem:[#allocation2 + $0x190] sm:$0xff]  ;;  %v62_v33 = vld [vmem:[#allocation2 + $0xe8] sm:$0xff]  ;;  %v88_v16 = vld [vmem:[#allocation2 + $0x1b8] sm:$0xff] }
  0x38   :  { %v195_v34 = vunpack.c.l.bf16 %v82_v22  ;;  %v196_v35 = vunpack.c.h.bf16 %v82_v22  ;;  %v350_v37 = vadd.f32 %v349_v27, %v192_v15  ;;  %v153_v38 = vunpack.c.l.bf16 %v61_v23 }
  0x39   :  { %v245_v52 = vadd.f32 %v244_v42, %v139_v30  ;;  %v282_v53 = vadd.f32 %v281_v43, %v140_v31  ;;  %v313_v36 = vadd.f32 %v312_v26, %v191_v14  ;;  %v154_v39 = vunpack.c.h.bf16 %v61_v23  ;;  %v84_v42 = vld [vmem:[#allocation2 + $0x198] sm:$0xff]  ;;  %v63_v43 = vld [vmem:[#allocation2 + $0xf0] sm:$0xff]  ;;  %v89_v23 = vld [vmem:[#allocation2 + $0x1c0] sm:$0xff] }
  0x3a   :  { %v197_v44 = vunpack.c.l.bf16 %v83_v32  ;;  %v198_v45 = vunpack.c.h.bf16 %v83_v32  ;;  %v351_v47 = vadd.f32 %v350_v37, %v194_v25  ;;  %v155_v48 = vunpack.c.l.bf16 %v62_v33 }
  0x3b   :  { %v246_v62 = vadd.f32 %v245_v52, %v141_v40  ;;  %v283_v63 = vadd.f32 %v282_v53, %v142_v41  ;;  %v314_v46 = vadd.f32 %v313_v36, %v193_v24  ;;  %v156_v49 = vunpack.c.h.bf16 %v62_v33  ;;  %v85_v52 = vld [vmem:[#allocation2 + $0x1a0] sm:$0xff]  ;;  %v64_v53 = vld [vmem:[#allocation2 + $0xf8] sm:$0xff] }
  0x3c   :  { %v199_v54 = vunpack.c.l.bf16 %v84_v42  ;;  %v200_v55 = vunpack.c.h.bf16 %v84_v42  ;;  %v352_v57 = vadd.f32 %v351_v47, %v196_v35  ;;  %v157_v58 = vunpack.c.l.bf16 %v63_v43 }
  0x3d   :  { %v247_v10 = vadd.f32 %v246_v62, %v143_v50  ;;  %v284_v11 = vadd.f32 %v283_v63, %v144_v51  ;;  %v315_v56 = vadd.f32 %v314_v46, %v195_v34  ;;  %v158_v59 = vunpack.c.h.bf16 %v63_v43  ;;  %v86_v62 = vld [vmem:[#allocation2 + $0x1a8] sm:$0xff]  ;;  %v92_v46 = vld [vmem:[#allocation2 + $0x1d8] sm:$0xff] }
  0x3e   :  { %v201_v63 = vunpack.c.l.bf16 %v85_v52  ;;  %v202_v2 = vunpack.c.h.bf16 %v85_v52  ;;  %v353_v4 = vadd.f32 %v352_v57, %v198_v45  ;;  %v159_v5 = vunpack.c.l.bf16 %v64_v53 }
  0x3f   :  { %v248_v20 = vadd.f32 %v247_v10, %v145_v60  ;;  %v285_v21 = vadd.f32 %v284_v11, %v146_v61  ;;  %v316_v3 = vadd.f32 %v315_v56, %v197_v44  ;;  %v160_v6 = vunpack.c.h.bf16 %v64_v53 }
  0x40   :  { %v203_v10 = vunpack.c.l.bf16 %v86_v62  ;;  %v204_v11 = vunpack.c.h.bf16 %v86_v62  ;;  %v354_v13 = vadd.f32 %v353_v4, %v200_v55  ;;  %v207_v24 = vunpack.c.l.bf16 %v88_v16  ;;  %v93_v55 = vld [vmem:[#allocation2 + $0x1e0] sm:$0xff]  ;;  %v94_v62 = vld [vmem:[#allocation2 + $0x1e8] sm:$0xff] }
  0x41   :  { %v249_v30 = vadd.f32 %v248_v20, %v147_v8  ;;  %v286_v31 = vadd.f32 %v285_v21, %v148_v9  ;;  %v87_v9 = vld [vmem:[#allocation2 + $0x1b0] sm:$0xff]  ;;  %v317_v12 = vadd.f32 %v316_v3, %v199_v54  ;;  %v208_v25 = vunpack.c.h.bf16 %v88_v16 }
  0x42   :  { %v205_v17 = vunpack.c.l.bf16 %v87_v9  ;;  %v355_v20 = vadd.f32 %v354_v13, %v202_v2  ;;  %v210_v32 = vunpack.c.h.bf16 %v89_v23  ;;  %v492_v35 = vmov 1966171168   ;;  %v96_v13 = vld [vmem:[#allocation2 + $0x1f8] sm:$0xff] }
  0x43   :  { %v250_v40 = vadd.f32 %v249_v30, %v149_v18  ;;  %v287_v41 = vadd.f32 %v286_v31, %v150_v19  ;;  %v206_v18 = vunpack.c.h.bf16 %v87_v9  ;;  %v318_v19 = vadd.f32 %v317_v12, %v201_v63  ;;  %v90_v30 = vld [vmem:[#allocation2 + $0x1c8] sm:$0xff] }
  0x44   :  { %v356_v27 = vadd.f32 %v355_v20, %v204_v11  ;;  %v209_v31 = vunpack.c.l.bf16 %v89_v23  ;;  %v381_v36 = vunpack.c.l.s4 %v492_v35  ;;  %v384_v52 = vshrl.u32 %v27_v0, 7 }
  0x45   :  { %v251_v50 = vadd.f32 %v250_v40, %v151_v28  ;;  %v288_v51 = vadd.f32 %v287_v41, %v152_v29  ;;  %v319_v26 = vadd.f32 %v318_v19, %v203_v10  ;;  %v211_v40 = vunpack.c.l.bf16 %v90_v30  ;;  %v373_v19 = vld [vmem:[#allocation5] sm:$0x3] }
  0x46   :  { %v357_v34 = vadd.f32 %v356_v27, %v206_v18  ;;  %v212_v41 = vunpack.c.h.bf16 %v90_v30  ;;  %v215_v56 = vunpack.c.l.bf16 %v92_v46  ;;  %v216_v57 = vunpack.c.h.bf16 %v92_v46 }
  0x47   :  { %v252_v60 = vadd.f32 %v251_v50, %v153_v38  ;;  %v289_v61 = vadd.f32 %v288_v51, %v154_v39  ;;  %v320_v33 = vadd.f32 %v319_v26, %v205_v17  ;;  %v91_v39 = vld [vmem:[#allocation2 + $0x1d0] sm:$0xff]  ;;  %v382_v51 = vunpack.c.0.s8 %v381_v36 }
  0x48   :  { %v358_v43 = vadd.f32 %v357_v34, %v208_v25  ;;  %v213_v47 = vunpack.c.l.bf16 %v91_v39  ;;  %v217_v63 = vunpack.c.l.bf16 %v93_v55  ;;  %v218_v2 = vunpack.c.h.bf16 %v93_v55 }
  0x49   :  { %v253_v7 = vadd.f32 %v252_v60, %v155_v48  ;;  %v290_v8 = vadd.f32 %v289_v61, %v156_v49  ;;  %v321_v42 = vadd.f32 %v320_v33, %v207_v24  ;;  %v214_v48 = vunpack.c.h.bf16 %v91_v39 }
  0x4a   :  { %v359_v50 = vadd.f32 %v358_v43, %v210_v32  ;;  %v219_v9 = vunpack.c.l.bf16 %v94_v62  ;;  %v220_v0 = vunpack.c.h.bf16 %v94_v62  ;;  %v223_v20 = vunpack.c.l.bf16 %v96_v13 }
  0x4b   :  { %v254_v14 = vadd.f32 %v253_v7, %v157_v58  ;;  %v291_v15 = vadd.f32 %v290_v8, %v158_v59  ;;  %v322_v49 = vadd.f32 %v321_v42, %v209_v31  ;;  %v95_v8 = vld [vmem:[#allocation2 + $0x1f0] sm:$0xff] }
  0x4c   :  { %v360_v59 = vadd.f32 %v359_v50, %v212_v41 }
  0x4d   :  { %v255_v21 = vadd.f32 %v254_v14, %v159_v5  ;;  %v292_v22 = vadd.f32 %v291_v15, %v160_v6  ;;  %v323_v58 = vadd.f32 %v322_v49, %v211_v40  ;;  %v385_v5 = vsub.s32 %v382_v51, %v384_v52 }
  0x4e   :  { %v361_v4 = vadd.f32 %v360_v59, %v214_v48  ;;  %v221_v14 = vunpack.c.l.bf16 %v95_v8  ;;  %v222_v15 = vunpack.c.h.bf16 %v95_v8 }
  0x4f   :  { %v256_v28 = vrot.slane %v255_v21, 4  ;;  %v293_v29 = vrot.slane %v292_v22, 4  ;;  %v324_v3 = vadd.f32 %v323_v58, %v213_v47 }
  0x50   :  { %v362_v11 = vadd.f32 %v361_v4, %v216_v57 }
  0x51   :  { %v257_v37 = vadd.f32 %v256_v28, %v255_v21  ;;  %v294_v38 = vadd.f32 %v293_v29, %v292_v22  ;;  %v325_v10 = vadd.f32 %v324_v3, %v215_v56  ;;  %v224_v21 = vunpack.c.h.bf16 %v96_v13 }
  0x52   :  { %v363_v17 = vadd.f32 %v362_v11, %v218_v2 }
  0x53   :  { %v258_v44 = vrot.slane %v257_v37, 2  ;;  %v295_v45 = vrot.slane %v294_v38, 2  ;;  %v326_v16 = vadd.f32 %v325_v10, %v217_v63 }
  0x54   :  { %v364_v23 = vadd.f32 %v363_v17, %v220_v0 }
  0x55   :  { %v259_v53 = vadd.f32 %v258_v44, %v257_v37  ;;  %v296_v54 = vadd.f32 %v295_v45, %v294_v38  ;;  %v327_v22 = vadd.f32 %v326_v16, %v219_v9  ;;  %v374_v44 = vld [vmem:[#allocation5 + $0x2] sm:$0x3] }
  0x56   :  { %v365_v26 = vadd.f32 %v364_v23, %v222_v15 }
  0x57   :  { %v260_v60 = vrot.slane %v259_v53, 1  ;;  %v297_v61 = vrot.slane %v296_v54, 1  ;;  %v328_v25 = vadd.f32 %v327_v22, %v221_v14 }
  0x58   :  { %v366_v29 = vadd.f32 %v365_v26, %v224_v21 }
  0x59   :  { %v261_v6 = vadd.f32 %v260_v60, %v259_v53  ;;  %v298_v7 = vadd.f32 %v297_v61, %v296_v54  ;;  %v329_v28 = vadd.f32 %v328_v25, %v223_v20 }
  0x5a   :  { %v367_v31 = vrot.slane %v366_v29, 4 }
  0x5b   :  { %v379_v12 = vcombine.low %v261_v6, %v298_v7  ;;  %v330_v30 = vrot.slane %v329_v28, 4 }
  0x5c   :  { %v368_v33 = vadd.f32 %v367_v31, %v366_v29 }
  0x5d   :  { %v386_v18 = vrot.slane %v379_v12, %v385_v5  ;;  %v331_v32 = vadd.f32 %v330_v30, %v329_v28 }
  0x5e   :  { %v369_v35 = vrot.slane %v368_v33, 2 }
  0x5f   :  { %v393_v24 = vrot.slane %v386_v18, %v385_v5  ;;  %v332_v34 = vrot.slane %v331_v32, 2 }
  0x60   :  { %v370_v37 = vadd.f32 %v369_v35, %v368_v33 }
  0x61   :  { %v411_v27 = vadd.f32 %v393_v24, %v373_v19  ;;  %v333_v36 = vadd.f32 %v332_v34, %v331_v32 }
  0x62   :  { %v371_v39 = vrot.slane %v370_v37, 1 }
  0x63   :  { %417 = vst.msk [vmem:[#allocation5] sm:$0x3] %vm510_vm0, %v411_v27  ;;  %v334_v38 = vrot.slane %v333_v36, 1 }
  0x64   :  { %v372_v41 = vadd.f32 %v371_v39, %v370_v37 }
  0x65   :  { %v335_v40 = vadd.f32 %v334_v38, %v333_v36 }
  0x67   :  { %v394_v42 = vcombine.low %v335_v40, %v372_v41 }
  0x69   :  { %v401_v43 = vrot.slane %v394_v42, %v385_v5 }
  0x6b   :  { %v408_v45 = vrot.slane %v401_v43, %v385_v5 }
  0x6d   :  { %v412_v46 = vadd.f32 %v408_v45, %v374_v44 }
  0x6f   :  { %418 = vst.msk [vmem:[#allocation5 + $0x2] sm:$0x3] %vm510_vm0, %v412_v46 }
  0x70   :  { %475 = shalt.err (!%p472_p9)
}
  0x71   :  { %s494_s15 = smov 32   ;;  %s495_s16 = smov 2  }
  0x72   :  { %430 = dma.vmem_to_hbm [thread:$0]  %s425_s13, 64, %s527_s1, [#allocation4], %s494_s15, %s494_s15, %s495_s16  }
  0x73   :  { %486 = dma.done.wait [#allocation4], 64  }
  0x74   :  { %487 = vsyncadd [#allocation4], 4294967232 }
  0x75   :  { %434 = vsyncpa [#allocation3], 1 }
  0x76   :  { %435 = vsyncpa [#allocation4], 1 }

</bundles_post_ra>
